<compile_context>
chip_gen: v7x
topology: tpu7x:2x2x1
jax: 0.10.0
libtpu: 0.0.40
codegen_flags: <defaults>
</compile_context>

<pallas_src>
import functools

import numpy as np
import jax
import jax.numpy as jnp
from jax.experimental import pallas as pl
from jax.experimental.pallas import tpu as pltpu


# ---------------------------------------------------------------------------
# Kernel: context_map -> MADE (MaskedLinear, ReLU, MaskedLinear pre-sliced into
# mu / neg-alpha columns) -> u = (x - mu) * exp(neg_alpha),
# log_det = h @ w2_ld + b2_ld  (== -sum(alpha, axis=1))
# ---------------------------------------------------------------------------
def maf_forward_kernel(x_ref, ctx_ref,
                       wc_ref, bc_ref,
                       w1c_ref, w1x_ref, b1_ref,
                       w2mu_ref, b2mu_ref,
                       w2na_ref, b2na_ref,
                       w2ld_ref, b2ld_ref,
                       u_ref, logdet_ref):
    x = x_ref[...]                                     # [TB, F]
    ctx = ctx_ref[...]                                 # [TB, C]

    # self.context_map(context): Linear(C, C)
    cmapped = jnp.dot(ctx, wc_ref[...],
                      preferred_element_type=jnp.float32) + bc_ref[...]

    # _x = cat([cmapped, x], dim=1); first MaskedLinear done as a split matmul
    # over the context-rows and x-rows of W1 (avoids an in-kernel lane concat).
    h = (jnp.dot(cmapped, w1c_ref[...], preferred_element_type=jnp.float32)
         + jnp.dot(x, w1x_ref[...], preferred_element_type=jnp.float32)
         + b1_ref[...])
    h = jnp.maximum(h, 0.0)                            # ReLU, [TB, H]

    # Only the mu / alpha columns of the second MaskedLinear are ever used,
    # so the weights are pre-sliced on the host; alpha is pre-negated.
    mu = jnp.dot(h, w2mu_ref[...],
                 preferred_element_type=jnp.float32) + b2mu_ref[...]      # [TB, F]
    neg_alpha = jnp.dot(h, w2na_ref[...],
                        preferred_element_type=jnp.float32) + b2na_ref[...]  # [TB, F]

    u_ref[...] = (x - mu) * jnp.exp(neg_alpha)

    # log_det = -sum(alpha, axis=1) = sum(neg_alpha, axis=1) folded into a
    # matvec that rides the MXU instead of an XLU cross-lane reduction.
    logdet_ref[...] = (jnp.dot(h, w2ld_ref[...],
                               preferred_element_type=jnp.float32)
                       + b2ld_ref[...])                # [TB, 1]


def _pad_tile_bytes(rows, cols, itemsize=4):
    """Bytes of a (rows, cols) f32 array padded to (8, 128) VMEM tiles."""
    r = -(-rows // 8) * 8
    c = -(-cols // 128) * 128
    return int(r * c * itemsize)


def maf_forward(x, ctx, params, *, context, features, block_batch=512):
    B = x.shape[0]
    F, C = features, context
    H = params["w1x"].shape[1]

    # Batch tile: full batch if small, else a multiple-of-8 tile (big tiles
    # keep HBM pipelining near roofline; remainder blocks are handled by
    # Pallas padding/masking since the computation is row-independent).
    TB = B if B <= block_batch else block_batch
    if TB != B:
        TB = max(8, (TB // 8) * 8)
    grid = (pl.cdiv(B, TB),)

    weight_args = (params["wc"], params["bc"],
                   params["w1c"], params["w1x"], params["b1"],
                   params["w2_mu"], params["b2_mu"],
                   params["w2_na"], params["b2_na"],
                   params["w2_ld"], params["b2_ld"])

    # VMEM budget (v7x has only 64 MiB physical / 32 MiB default scoped):
    # resident weights + double-buffered activation tiles + output tiles.
    resident = sum(_pad_tile_bytes(w.shape[0], w.shape[1]) for w in weight_args)
    pipelined = 2 * (_pad_tile_bytes(TB, F) + _pad_tile_bytes(TB, C)) \
              + 2 * (_pad_tile_bytes(TB, F) + _pad_tile_bytes(TB, 1))
    vmem_limit = min(64 << 20, max(resident + pipelined + (4 << 20), 16 << 20))

    # Weight specs: constant index_map -> fetched once, VMEM-resident.
    def _w_spec(arr):
        return pl.BlockSpec(arr.shape, lambda i: (0, 0))

    in_specs = ([pl.BlockSpec((TB, F), lambda i: (i, 0)),
                 pl.BlockSpec((TB, C), lambda i: (i, 0))]
                + [_w_spec(w) for w in weight_args])
    out_specs = (pl.BlockSpec((TB, F), lambda i: (i, 0)),
                 pl.BlockSpec((TB, 1), lambda i: (i, 0)))

    flops = 2 * B * (C * C + (C + F) * H + H * (2 * F + 1))
    bytes_accessed = 4 * (B * (C + F)                       # inputs
                          + B * (F + 1)                     # outputs
                          + sum(int(np.prod(w.shape)) for w in weight_args))
    cost = pl.CostEstimate(flops=flops,
                           transcendentals=B * F,
                           bytes_accessed=bytes_accessed)

    u, logdet = pl.pallas_call(
        maf_forward_kernel,
        out_shape=(jax.ShapeDtypeStruct((B, F), jnp.float32),
                   jax.ShapeDtypeStruct((B, 1), jnp.float32)),
        grid=grid,
        in_specs=in_specs,
        out_specs=out_specs,
        compiler_params=pltpu.CompilerParams(
            dimension_semantics=("parallel",),   # batch is embarrassingly parallel
            vmem_limit_bytes=vmem_limit),
        cost_estimate=cost,
    )(x, ctx, *weight_args)
    # TODO(synk): if F stays tiny in production, pack u/log_det into one
    # lane-dense 128-wide output block to avoid sub-128 masked stores.
    return u, logdet[:, 0]


# ---------------------------------------------------------------------------
# Parameter / mask construction (deterministic, mirrors MADE.update_masks)
# ---------------------------------------------------------------------------
def build_made_masks(nin, hidden_sizes, nout, natural_ordering=True, seed=0):
    L = len(hidden_sizes)
    rng = np.random.RandomState(seed)
    m = {}
    m[-1] = np.arange(nin) if natural_ordering else rng.permutation(nin)
    for l in range(L):
        m[l] = rng.randint(m[l - 1].min(), nin - 1, size=hidden_sizes[l])
    masks = [m[l - 1][:, None] <= m[l][None, :] for l in range(L)]
    masks.append(m[L - 1][:, None] < m[-1][None, :])
    if nout > nin:
        k = int(nout / nin)
        masks[-1] = np.concatenate([masks[-1]] * k, axis=1)
    # each mask is [in, out]; effective in->out weight is mask * W_in_out
    return [msk.astype(np.float32) for msk in masks]


def build_params(key, features, context, hidden):
    nin = features + context
    nout = 2 * nin
    ks = jax.random.split(key, 6)

    def init(k, shape, fan_in):
        bound = 1.0 / np.sqrt(fan_in)
        return jax.random.uniform(k, shape, jnp.float32, -bound, bound)

    # context_map: Linear(context, context)  -> [in, out]
    wc = init(ks[0], (context, context), context)
    bc = init(ks[1], (1, context), context)

    # MADE layers ([in, out] layout)
    w1 = init(ks[2], (nin, hidden), nin)
    b1 = init(ks[3], (1, hidden), nin)
    w2 = init(ks[4], (hidden, nout), hidden)
    b2 = init(ks[5], (1, nout), hidden)

    masks = build_made_masks(nin, [hidden], nout, natural_ordering=True, seed=0)
    w1_eff = w1 * jnp.asarray(masks[0])
    w2_eff = w2 * jnp.asarray(masks[1])

    C, F = context, features
    # Host-side pre-slicing of the second MaskedLinear:
    #   mu columns    : [C : C+F]
    #   alpha columns : [2C+F : 2C+2F]    (stored negated -> neg_alpha)
    w2_mu = w2_eff[:, C:C + F]
    b2_mu = b2[:, C:C + F]
    w2_na = -w2_eff[:, 2 * C + F:]
    b2_na = -b2[:, 2 * C + F:]
    # log_det matvec: sum(neg_alpha, axis=1) = h @ w2_ld + b2_ld
    w2_ld = jnp.sum(w2_na, axis=1, keepdims=True)        # [H, 1]
    b2_ld = jnp.sum(b2_na, axis=1, keepdims=True)        # [1, 1]

    # TODO(synk): at real (hidden >= 1024) sizes, cast the masked weights to
    # bfloat16 on v6e/v7x and keep f32 accumulation/elementwise.
    params = dict(
        wc=wc, bc=bc,
        w1c=w1_eff[:C, :], w1x=w1_eff[C:, :], b1=b1,
        w2_mu=w2_mu, b2_mu=b2_mu,
        w2_na=w2_na, b2_na=b2_na,
        w2_ld=w2_ld, b2_ld=b2_ld,
        # full matrices kept only for the pure-JAX reference check
        ref_w2=w2_eff, ref_b2=b2,
    )
    return params


# ---------------------------------------------------------------------------
# Pure-JAX reference (mirrors the PyTorch forward exactly) for verification
# ---------------------------------------------------------------------------
def maf_forward_ref(x, ctx, params, *, context, features):
    cmapped = ctx @ params["wc"] + params["bc"]
    _x = jnp.concatenate([cmapped, x], axis=1)
    w1 = jnp.concatenate([params["w1c"], params["w1x"]], axis=0)
    h = jnp.maximum(_x @ w1 + params["b1"], 0.0)
    out = h @ params["ref_w2"] + params["ref_b2"]
    mu = out[:, context:context + features]
    alpha = out[:, 2 * context + features:]
    u = (x - mu) * jnp.exp(-alpha)
    log_det = -jnp.sum(alpha, axis=1)
    return u, log_det


if __name__ == "__main__":
    B, FEATURES, CONTEXT, HIDDEN = 16, 4, 4, 32
    TILE_B = 8   # small tile so the test exercises a multi-step grid

    key = jax.random.PRNGKey(0)
    kx, kc, kp = jax.random.split(key, 3)
    x = jax.random.normal(kx, (B, FEATURES), dtype=jnp.float32)
    ctx = jax.random.normal(kc, (B, CONTEXT), dtype=jnp.float32)
    params = build_params(kp, FEATURES, CONTEXT, HIDDEN)

    u, log_det = maf_forward(x, ctx, params, context=CONTEXT,
                             features=FEATURES, block_batch=TILE_B)
    jax.block_until_ready((u, log_det))

    u_ref, log_det_ref = maf_forward_ref(x, ctx, params,
                                         context=CONTEXT, features=FEATURES)
    np.testing.assert_allclose(np.asarray(u), np.asarray(u_ref),
                               rtol=1e-5, atol=1e-5)
    np.testing.assert_allclose(np.asarray(log_det), np.asarray(log_det_ref),
                               rtol=1e-5, atol=1e-5)

    print("KERNEL_OK")
</pallas_src>

<mosaic_0001>
module attributes {stable_mosaic.version = 11 : i64} {
  func.func @maf_forward_kernel(%arg0: i32, %arg1: memref<8x4xf32, #tpu.memory_space<vmem>>, %arg2: memref<8x4xf32, #tpu.memory_space<vmem>>, %arg3: memref<4x4xf32, #tpu.memory_space<vmem>>, %arg4: memref<1x4xf32, #tpu.memory_space<vmem>>, %arg5: memref<4x32xf32, #tpu.memory_space<vmem>>, %arg6: memref<4x32xf32, #tpu.memory_space<vmem>>, %arg7: memref<1x32xf32, #tpu.memory_space<vmem>>, %arg8: memref<32x4xf32, #tpu.memory_space<vmem>>, %arg9: memref<1x4xf32, #tpu.memory_space<vmem>>, %arg10: memref<32x4xf32, #tpu.memory_space<vmem>>, %arg11: memref<1x4xf32, #tpu.memory_space<vmem>>, %arg12: memref<32x1xf32, #tpu.memory_space<vmem>>, %arg13: memref<1x1xf32, #tpu.memory_space<vmem>>, %arg14: memref<8x4xf32, #tpu.memory_space<vmem>>, %arg15: memref<8x1xf32, #tpu.memory_space<vmem>>) attributes {dimension_semantics = [#tpu.dimension_semantics<parallel>], iteration_bounds = array<i64: 2>, scalar_prefetch = 0 : i64, scratch_operands = 0 : i64, tpu.core_type = #tpu.core_type<tc>, window_params = [{transform_indices = @transform_0, window_bounds = array<i64: 8, 4>}, {transform_indices = @transform_1, window_bounds = array<i64: 8, 4>}, {pipeline_mode = #tpu.pipeline_mode<synchronous>, transform_indices = @transform_2, window_bounds = array<i64: 4, 4>}, {pipeline_mode = #tpu.pipeline_mode<synchronous>, transform_indices = @transform_3, window_bounds = array<i64: 1, 4>}, {pipeline_mode = #tpu.pipeline_mode<synchronous>, transform_indices = @transform_4, window_bounds = array<i64: 4, 32>}, {pipeline_mode = #tpu.pipeline_mode<synchronous>, transform_indices = @transform_5, window_bounds = array<i64: 4, 32>}, {pipeline_mode = #tpu.pipeline_mode<synchronous>, transform_indices = @transform_6, window_bounds = array<i64: 1, 32>}, {pipeline_mode = #tpu.pipeline_mode<synchronous>, transform_indices = @transform_7, window_bounds = array<i64: 32, 4>}, {pipeline_mode = #tpu.pipeline_mode<synchronous>, transform_indices = @transform_8, window_bounds = array<i64: 1, 4>}, {pipeline_mode = #tpu.pipeline_mode<synchronous>, transform_indices = @transform_9, window_bounds = array<i64: 32, 4>}, {pipeline_mode = #tpu.pipeline_mode<synchronous>, transform_indices = @transform_10, window_bounds = array<i64: 1, 4>}, {pipeline_mode = #tpu.pipeline_mode<synchronous>, transform_indices = @transform_11, window_bounds = array<i64: 32, 1>}, {pipeline_mode = #tpu.pipeline_mode<synchronous>, transform_indices = @transform_12, window_bounds = array<i64: 1, 1>}, {transform_indices = @transform_13, window_bounds = array<i64: 8, 4>}, {transform_indices = @transform_14, window_bounds = array<i64: 8, 1>}]} {
    %c0 = arith.constant 0 : index
    %c0_0 = arith.constant 0 : index
    %0 = vector.load %arg1[%c0, %c0_0] : memref<8x4xf32, #tpu.memory_space<vmem>>, vector<8x4xf32>
    %c0_1 = arith.constant 0 : index
    %c0_2 = arith.constant 0 : index
    %1 = vector.load %arg2[%c0_1, %c0_2] : memref<8x4xf32, #tpu.memory_space<vmem>>, vector<8x4xf32>
    %c0_3 = arith.constant 0 : index
    %c0_4 = arith.constant 0 : index
    %2 = vector.load %arg3[%c0_3, %c0_4] : memref<4x4xf32, #tpu.memory_space<vmem>>, vector<4x4xf32>
    %cst = arith.constant dense<0.000000e+00> : vector<8x4xf32>
    %3 = tpu.matmul %1, %2, %cst {dimension_numbers = #tpu.dot_dimension_numbers<[1], [0], [0], [1], [0, 0, 1, 1], [], []>} : vector<8x4xf32>, vector<4x4xf32>, vector<8x4xf32> -> vector<8x4xf32>
    %c0_5 = arith.constant 0 : index
    %c0_6 = arith.constant 0 : index
    %4 = vector.load %arg4[%c0_5, %c0_6] : memref<1x4xf32, #tpu.memory_space<vmem>>, vector<1x4xf32>
    %5 = vector.broadcast %4 : vector<1x4xf32> to vector<8x4xf32>
    %6 = arith.addf %3, %5 : vector<8x4xf32>
    %c0_7 = arith.constant 0 : index
    %c0_8 = arith.constant 0 : index
    %7 = vector.load %arg5[%c0_7, %c0_8] : memref<4x32xf32, #tpu.memory_space<vmem>>, vector<4x32xf32>
    %cst_9 = arith.constant dense<0.000000e+00> : vector<8x32xf32>
    %8 = tpu.matmul %6, %7, %cst_9 {dimension_numbers = #tpu.dot_dimension_numbers<[1], [0], [0], [1], [0, 0, 1, 1], [], []>} : vector<8x4xf32>, vector<4x32xf32>, vector<8x32xf32> -> vector<8x32xf32>
    %c0_10 = arith.constant 0 : index
    %c0_11 = arith.constant 0 : index
    %9 = vector.load %arg6[%c0_10, %c0_11] : memref<4x32xf32, #tpu.memory_space<vmem>>, vector<4x32xf32>
    %cst_12 = arith.constant dense<0.000000e+00> : vector<8x32xf32>
    %10 = tpu.matmul %0, %9, %cst_12 {dimension_numbers = #tpu.dot_dimension_numbers<[1], [0], [0], [1], [0, 0, 1, 1], [], []>} : vector<8x4xf32>, vector<4x32xf32>, vector<8x32xf32> -> vector<8x32xf32>
    %11 = arith.addf %8, %10 : vector<8x32xf32>
    %c0_13 = arith.constant 0 : index
    %c0_14 = arith.constant 0 : index
    %12 = vector.load %arg7[%c0_13, %c0_14] : memref<1x32xf32, #tpu.memory_space<vmem>>, vector<1x32xf32>
    %13 = vector.broadcast %12 : vector<1x32xf32> to vector<8x32xf32>
    %14 = arith.addf %11, %13 : vector<8x32xf32>
    %cst_15 = arith.constant 0.000000e+00 : f32
    %15 = vector.broadcast %cst_15 : f32 to vector<8x32xf32>
    %16 = arith.maximumf %14, %15 : vector<8x32xf32>
    %c0_16 = arith.constant 0 : index
    %c0_17 = arith.constant 0 : index
    %17 = vector.load %arg8[%c0_16, %c0_17] : memref<32x4xf32, #tpu.memory_space<vmem>>, vector<32x4xf32>
    %cst_18 = arith.constant dense<0.000000e+00> : vector<8x4xf32>
    %18 = tpu.matmul %16, %17, %cst_18 {dimension_numbers = #tpu.dot_dimension_numbers<[1], [0], [0], [1], [0, 0, 1, 1], [], []>} : vector<8x32xf32>, vector<32x4xf32>, vector<8x4xf32> -> vector<8x4xf32>
    %c0_19 = arith.constant 0 : index
    %c0_20 = arith.constant 0 : index
    %19 = vector.load %arg9[%c0_19, %c0_20] : memref<1x4xf32, #tpu.memory_space<vmem>>, vector<1x4xf32>
    %20 = vector.broadcast %19 : vector<1x4xf32> to vector<8x4xf32>
    %21 = arith.addf %18, %20 : vector<8x4xf32>
    %c0_21 = arith.constant 0 : index
    %c0_22 = arith.constant 0 : index
    %22 = vector.load %arg10[%c0_21, %c0_22] : memref<32x4xf32, #tpu.memory_space<vmem>>, vector<32x4xf32>
    %cst_23 = arith.constant dense<0.000000e+00> : vector<8x4xf32>
    %23 = tpu.matmul %16, %22, %cst_23 {dimension_numbers = #tpu.dot_dimension_numbers<[1], [0], [0], [1], [0, 0, 1, 1], [], []>} : vector<8x32xf32>, vector<32x4xf32>, vector<8x4xf32> -> vector<8x4xf32>
    %c0_24 = arith.constant 0 : index
    %c0_25 = arith.constant 0 : index
    %24 = vector.load %arg11[%c0_24, %c0_25] : memref<1x4xf32, #tpu.memory_space<vmem>>, vector<1x4xf32>
    %25 = vector.broadcast %24 : vector<1x4xf32> to vector<8x4xf32>
    %26 = arith.addf %23, %25 : vector<8x4xf32>
    %27 = arith.subf %0, %21 : vector<8x4xf32>
    %28 = math.exp %26 : vector<8x4xf32>
    %29 = arith.mulf %27, %28 : vector<8x4xf32>
    %c0_26 = arith.constant 0 : index
    %c0_27 = arith.constant 0 : index
    %30 = vector.load %arg14[%c0_26, %c0_27] : memref<8x4xf32, #tpu.memory_space<vmem>>, vector<8x4xf32>
    tpu.vector_store %arg14[%c0_26, %c0_27], %29 {strides = array<i32>} : memref<8x4xf32, #tpu.memory_space<vmem>>, vector<8x4xf32>,
    %c0_28 = arith.constant 0 : index
    %c0_29 = arith.constant 0 : index
    %31 = vector.load %arg12[%c0_28, %c0_29] : memref<32x1xf32, #tpu.memory_space<vmem>>, vector<32x1xf32>
    %cst_30 = arith.constant dense<0.000000e+00> : vector<8x1xf32>
    %32 = tpu.matmul %16, %31, %cst_30 {dimension_numbers = #tpu.dot_dimension_numbers<[1], [0], [0], [1], [0, 0, 1, 1], [], []>} : vector<8x32xf32>, vector<32x1xf32>, vector<8x1xf32> -> vector<8x1xf32>
    %c0_31 = arith.constant 0 : index
    %c0_32 = arith.constant 0 : index
    %33 = vector.load %arg13[%c0_31, %c0_32] : memref<1x1xf32, #tpu.memory_space<vmem>>, vector<1x1xf32>
    %34 = vector.broadcast %33 : vector<1x1xf32> to vector<8x1xf32>
    %35 = arith.addf %32, %34 : vector<8x1xf32>
    %c0_33 = arith.constant 0 : index
    %c0_34 = arith.constant 0 : index
    %36 = vector.load %arg15[%c0_33, %c0_34] : memref<8x1xf32, #tpu.memory_space<vmem>>, vector<8x1xf32>
    tpu.vector_store %arg15[%c0_33, %c0_34], %35 {strides = array<i32>} : memref<8x1xf32, #tpu.memory_space<vmem>>, vector<8x1xf32>,
    return
  }
  func.func @transform_0(%arg0: i32) -> (i32, i32) {
    %c0_i32 = arith.constant 0 : i32
    %c0_i32_0 = arith.constant 0 : i32
    return %arg0, %c0_i32 : i32, i32
  }
  func.func @transform_1(%arg0: i32) -> (i32, i32) {
    %c0_i32 = arith.constant 0 : i32
    %c0_i32_0 = arith.constant 0 : i32
    return %arg0, %c0_i32 : i32, i32
  }
  func.func @transform_2(%arg0: i32) -> (i32, i32) {
    %c0_i32 = arith.constant 0 : i32
    %c0_i32_0 = arith.constant 0 : i32
    %c0_i32_1 = arith.constant 0 : i32
    return %c0_i32, %c0_i32_0 : i32, i32
  }
  func.func @transform_3(%arg0: i32) -> (i32, i32) {
    %c0_i32 = arith.constant 0 : i32
    %c0_i32_0 = arith.constant 0 : i32
    %c0_i32_1 = arith.constant 0 : i32
    return %c0_i32, %c0_i32_0 : i32, i32
  }
  func.func @transform_4(%arg0: i32) -> (i32, i32) {
    %c0_i32 = arith.constant 0 : i32
    %c0_i32_0 = arith.constant 0 : i32
    %c0_i32_1 = arith.constant 0 : i32
    return %c0_i32, %c0_i32_0 : i32, i32
  }
  func.func @transform_5(%arg0: i32) -> (i32, i32) {
    %c0_i32 = arith.constant 0 : i32
    %c0_i32_0 = arith.constant 0 : i32
    %c0_i32_1 = arith.constant 0 : i32
    return %c0_i32, %c0_i32_0 : i32, i32
  }
  func.func @transform_6(%arg0: i32) -> (i32, i32) {
    %c0_i32 = arith.constant 0 : i32
    %c0_i32_0 = arith.constant 0 : i32
    %c0_i32_1 = arith.constant 0 : i32
    return %c0_i32, %c0_i32_0 : i32, i32
  }
  func.func @transform_7(%arg0: i32) -> (i32, i32) {
    %c0_i32 = arith.constant 0 : i32
    %c0_i32_0 = arith.constant 0 : i32
    %c0_i32_1 = arith.constant 0 : i32
    return %c0_i32, %c0_i32_0 : i32, i32
  }
  func.func @transform_8(%arg0: i32) -> (i32, i32) {
    %c0_i32 = arith.constant 0 : i32
    %c0_i32_0 = arith.constant 0 : i32
    %c0_i32_1 = arith.constant 0 : i32
    return %c0_i32, %c0_i32_0 : i32, i32
  }
  func.func @transform_9(%arg0: i32) -> (i32, i32) {
    %c0_i32 = arith.constant 0 : i32
    %c0_i32_0 = arith.constant 0 : i32
    %c0_i32_1 = arith.constant 0 : i32
    return %c0_i32, %c0_i32_0 : i32, i32
  }
  func.func @transform_10(%arg0: i32) -> (i32, i32) {
    %c0_i32 = arith.constant 0 : i32
    %c0_i32_0 = arith.constant 0 : i32
    %c0_i32_1 = arith.constant 0 : i32
    return %c0_i32, %c0_i32_0 : i32, i32
  }
  func.func @transform_11(%arg0: i32) -> (i32, i32) {
    %c0_i32 = arith.constant 0 : i32
    %c0_i32_0 = arith.constant 0 : i32
    %c0_i32_1 = arith.constant 0 : i32
    return %c0_i32, %c0_i32_0 : i32, i32
  }
  func.func @transform_12(%arg0: i32) -> (i32, i32) {
    %c0_i32 = arith.constant 0 : i32
    %c0_i32_0 = arith.constant 0 : i32
    %c0_i32_1 = arith.constant 0 : i32
    return %c0_i32, %c0_i32_0 : i32, i32
  }
  func.func @transform_13(%arg0: i32) -> (i32, i32) {
    %c0_i32 = arith.constant 0 : i32
    %c0_i32_0 = arith.constant 0 : i32
    return %arg0, %c0_i32 : i32, i32
  }
  func.func @transform_14(%arg0: i32) -> (i32, i32) {
    %c0_i32 = arith.constant 0 : i32
    %c0_i32_0 = arith.constant 0 : i32
    return %arg0, %c0_i32 : i32, i32
  }
}

</mosaic_0001>

<bundles_post_ra>
// kernel: tpu_custom_call.1
= control target key start
LH: loop header
LB: loop body
LE: loop exit
PB: predicated region body
PF: predicated region fallthrough
CT: control target
= control target key end

     0   :  { %s1308_s15 = smov 0   ;;  %s1420_s0 = inlined_call_operand.vmem [shape: f32[16,4], index: 0, kind: input, shape index: {}]   ;;  %s1421_s1 = inlined_call_operand.vmem [shape: f32[16,4], index: 1, kind: input, shape index: {}]   ;;  %s1422_s2 = inlined_call_operand.vmem [shape: f32[4,4], index: 2, kind: input, shape index: {}]   ;;  %s1423_s3 = inlined_call_operand.vmem [shape: f32[1,4], index: 3, kind: input, shape index: {}]   ;;  %s1424_s4 = inlined_call_operand.vmem [shape: f32[4,32], index: 4, kind: input, shape index: {}]   ;;  %s1425_s5 = inlined_call_operand.vmem [shape: f32[4,32], index: 5, kind: input, shape index: {}]   ;;  %s1426_s6 = inlined_call_operand.vmem [shape: f32[1,32], index: 6, kind: input, shape index: {}]   ;;  %s1427_s7 = inlined_call_operand.vmem [shape: f32[32,4], index: 7, kind: input, shape index: {}]   ;;  %s1428_s8 = inlined_call_operand.vmem [shape: f32[1,4], index: 8, kind: input, shape index: {}]   ;;  %s1429_s9 = inlined_call_operand.vmem [shape: f32[32,4], index: 9, kind: input, shape index: {}]   ;;  %s1430_s10 = inlined_call_operand.vmem [shape: f32[1,4], index: 10, kind: input, shape index: {}]   ;;  %s1431_s11 = inlined_call_operand.vmem [shape: f32[32,1], index: 11, kind: input, shape index: {}]   ;;  %s1432_s12 = inlined_call_operand.<no memory space> [shape: f32[1,1], index: 12, kind: input, shape index: {}]   ;;  %s1433_s13 = inlined_call_operand.vmem [shape: f32[16,4], index: 13, kind: output, shape index: {0}]   ;;  %s1434_s14 = inlined_call_operand.vmem [shape: f32[16,1], index: 14, kind: output, shape index: {1}]  }
   0x1   :  { %v20_v0 = vstv %s1432_s12 }
   0x2   :  { %21 = vst [vmem:[#allocation2] sm:$0x1] %v20_v0 }
   0x3 LB: > { %s1094_s16 = sadd.s32 4294967295, %s1225_s15   ;;  %p1098_p0 = scmp.ge.s32.totalorder %s1225_s15, 1  ;;  %s1225_s15 = sphi %s1308_s15, %s27_s15  }
   0x4   : > { %p425_p1 = scmp.lt.s32.totalorder %s1225_s15, 3 }
   0x6   : > { %p426_p2 = pnand %p1098_p0, %p425_p1 }
   0x7   : > { %v495_v1 = vld [vmem:[%s1422_s2] sm:$0xf] (!%p426_p2)  ;;  %vm507_vm0 = vcmask (!%p426_p2), 1043456   ;;  %p477_p3 = scmp.lt.s32.totalorder (!%p426_p2), %s1094_s16, 1  ;;  %v1227_v2 = vmov (!%p426_p2), 0.0   ;;  %vm1228_vm1 = vmmov (!%p426_p2), 0  }
   0x8   : > { %429 = sbr.rel (%p426_p2) target bundleno = 681 (0x2a9), region = 72  ;;  %1140 = vmatprep.subr.mxu0 (!%p426_p2), %v1227_v2  ;;  %1142 = vmatprep.mubr.msk.f32.mxu0 (!%p426_p2), %vm1228_vm1, %v1227_v2  ;;  %vm503_vm2 = vcmask (!%p426_p2), 31744   ;;  %v581_v3 = vld [vmem:[%s1424_s4] sm:$0xf] (!%p426_p2)  ;;  %v1229_v7 = vmov (!%p426_p2), 0.0|0.0   ;;  %v745_v9 = vld [vmem:[%s1427_s7 + $0x8] sm:$0xff] (!%p426_p2) }
   0x9   : > { %1141 = vmatpush3.msk.msra.mxu0 (!%p426_p2), %vm507_vm0, %v495_v1  ;;  %1145 = vmatprep.subr.mxu1 (!%p426_p2), %v1227_v2  ;;  %v582_v5 = vld [vmem:[%s1425_s5] sm:$0xf] (!%p426_p2)  ;;  %v830_v16 = vld [vmem:[%s1429_s9 + $0x8] sm:$0xff] (!%p426_p2)  ;;  %v746_v20 = vld [vmem:[%s1427_s7 + $0x10] sm:$0xff] (!%p426_p2)  ;;  %vm755_vm3 = vcmask (!%p426_p2), 261120   ;;  %vm996_vm4 = vcmask (!%p426_p2), 7168  }
   0xa   : > { %1150 = vmatprep.subr.mxu0 (!%p426_p2), %v1227_v2  ;;  %1147 = vmatprep.mubr.msk.f32.mxu1 (!%p426_p2), %vm1228_vm1, %v1227_v2  ;;  %v744_v8 = vld [vmem:[%s1427_s7] sm:$0xff] (!%p426_p2)  ;;  %v747_v21 = vld [vmem:[%s1427_s7 + $0x18] sm:$0xff] (!%p426_p2)  ;;  %v831_v23 = vld [vmem:[%s1429_s9 + $0x10] sm:$0xff] (!%p426_p2) }
   0xb   : > { %1146 = vmatpush3.msk.msra.mxu1 (!%p426_p2), %vm507_vm0, %v582_v5  ;;  %v1189_v10 = vpack.c.bf16 (!%p426_p2), %v745_v9, %v744_v8  ;;  %v1103_v11 = vld [vmem:[%s1423_s3] ss:$0 sm:$0xff] (!%p426_p2)  ;;  %v1192_v22 = vpack.c.bf16 (!%p426_p2), %v747_v21, %v746_v20  ;;  %v832_v24 = vld [vmem:[%s1429_s9 + $0x18] sm:$0xff] (!%p426_p2)  ;;  %v916_v31 = vld [vmem:[%s1431_s11 + $0x8] sm:$0xff] (!%p426_p2) }
   0xc   : > { %1188 = vmatprep.subr.bf16.mxu1 (!%p426_p2), %v1229_v7  ;;  %v829_v15 = vld [vmem:[%s1429_s9] sm:$0xff] (!%p426_p2)  ;;  %v1198_v25 = vpack.c.bf16 (!%p426_p2), %v832_v24, %v831_v23  ;;  %v917_v35 = vld [vmem:[%s1431_s11 + $0x10] sm:$0xff] (!%p426_p2)  ;;  %v918_v36 = vld [vmem:[%s1431_s11 + $0x18] sm:$0xff] (!%p426_p2) }
   0xd   : > { %v1195_v17 = vpack.c.bf16 (!%p426_p2), %v830_v16, %v829_v15  ;;  %v1110_v27 = vld [vmem:[%s1426_s6] ss:$0 sm:$0xff] (!%p426_p2)  ;;  %v1204_v37 = vpack.c.bf16 (!%p426_p2), %v918_v36, %v917_v35 }
   0xe   : > { %v915_v30 = vld [vmem:[%s1431_s11] sm:$0xff] (!%p426_p2) }
   0xf   : > { %s1436_s16 = smov (!%p477_p3, %s1094_s16), 1  ;;  %v1201_v33 = vpack.c.bf16 %v916_v31, %v915_v30  ;;  %v1113_v38 = vld [vmem:[%s1430_s10] ss:$0 sm:$0xff] }
  0x10   : > { %s1327_s12 = sshll.u32 %s1436_s16, 3  ;;  %v1115_v45 = vld [vmem:[#allocation2] ss:$0 sm:$0xff] }
  0x11   : > { %s484_s21 = scalar_lea.vmem %s1421_s1, %s1327_s12  ;;  %s480_s28 = scalar_lea.vmem %s1420_s0, %s1327_s12  ;;  %v1111_v46 = vld [vmem:[%s1428_s8] ss:$0 sm:$0xff] }
  0x12   : > { %v494_v4 = vld [vmem:[%s484_s21] sm:$0xff]  ;;  %s492_s18 = scalar_lea.vmem %s1434_s14, %s1327_s12  ;;  %s488_s21 = scalar_lea.vmem %s1433_s13, %s1327_s12 }
  0x13   : > { %1143 = vmatmul.mubr.msk.f32.vlgmr.msra.gmra.mrb[0].mxu0 %vm503_vm2, %v494_v4  ;;  %v1348_v6 = vld [vmem:[%s480_s28] sm:$0xff] }
  0x14   : > { %1151 = vmatpush3.msk.msra.mxu0 %vm507_vm0, %v581_v3  ;;  %1152 = vmatprep.mubr.msk.f32.mxu0 %vm1228_vm1, %v1227_v2 }
  0x15   : > { %1148 = vmatmul.mubr.msk.f32.vlgmr.msra.gmra.mrb[0].mxu1 %vm503_vm2, %v1348_v6  ;;  %1194 = vmatprep.subr.bf16.mxu0 %v1229_v7 }
  0x16   : > { %1163 = vmatprep.mubr.msk.f32.mxu1 %vm1228_vm1, %v1227_v2  ;;  %1190 = vmatpush3.bf16.msra.mxu1 %v1189_v10 }
  0x17   : > { %1191 = vmatprep.subr.bf16.mxu1 %v1229_v7 }
  0x1a   : > { %1193 = vmatpush3.bf16.msra.mxu1 %v1192_v22 }
  0x1b   : > { %1200 = vmatprep.subr.bf16.mxu1 %v1229_v7 }
  0xe6   : > { %v577_v12 = vpop.f32.mrb[0].mxu0 }
  0xe7   : > { %v578_v13 = vadd.f32 %v1103_v11, %v577_v12  ;;  %v1144_v14 = vpop.f32.mrb[1].mxu0 }
  0xe8   : > { %v655_v18 = vpop.f32.mrb[0].mxu1 }
  0xe9   : > { %1153 = vmatmul.mubr.msk.f32.vlgmr.msra.gmra.mrb[2].mxu0 %vm503_vm2, %v578_v13  ;;  %v1149_v19 = vpop.f32.mrb[1].mxu1 }
  0xea   : > { %1174 = vmatprep.mubr.msk.f32.mxu0 %vm1228_vm1, %v1227_v2  ;;  %1196 = vmatpush3.bf16.msra.mxu0 %v1195_v17 }
  0xeb   : > { %1197 = vmatprep.subr.bf16.mxu0 %v1229_v7 }
  0xee   : > { %1199 = vmatpush3.bf16.msra.mxu0 %v1198_v25 }
 0x1bc   : > { %v731_v26 = vpop.f32.mrb[2].mxu0 }
 0x1bd   : > { %v732_v28 = vadd.f32 %v731_v26, %v655_v18  ;;  %v1154_v29 = vpop.f32.mrb[3].mxu0 }
 0x1bf   : > { %v742_v32 = vadd.f32 %v1110_v27, %v732_v28 }
 0x1c1   : > { %v743_v34 = vmax.f32 %v742_v32, 0.0 }
 0x1c3   : > { %1164 = vmatmul.mubr.msk.f32.vlgmr.msra.gmra.mrb[2].mxu1 %vm755_vm3, %v743_v34  ;;  %1175 = vmatmul.mubr.msk.f32.vlgmr.msra.gmra.mrb[4].mxu0 %vm755_vm3, %v743_v34 }
 0x1c4   : > { %1202 = vmatpush3.bf16.msra.mxu1 %v1201_v33  ;;  %1185 = vmatprep.mubr.msk.f32.mxu1 %vm1228_vm1, %v1227_v2 }
 0x1c5   : > { %1203 = vmatprep.subr.bf16.mxu1 %v1229_v7 }
 0x1c8   : > { %1205 = vmatpush3.bf16.msra.mxu1 %v1204_v37 }
 0x1cb   : > { %1186 = vmatmul.mubr.msk.f32.vlgmr.msra.gmra.mrb[4].mxu1 %vm755_vm3, %v743_v34 }
 0x296   : > { %v825_v39 = vpop.f32.mrb[2].mxu1  ;;  %v906_v40 = vpop.f32.mrb[4].mxu0 }
 0x297   : > { %v907_v41 = vadd.f32 %v1113_v38, %v906_v40  ;;  %v1165_v42 = vpop.f32.mrb[3].mxu1  ;;  %v1176_v43 = vpop.f32.mrb[5].mxu0  ;;  %v826_v50 = vadd.f32 %v1111_v46, %v825_v39 }
 0x299   : > { %v911_v44 = vmul.f32 1.442695, %v907_v41  ;;  %v910_v51 = vsub.f32 %v1348_v6, %v826_v50 }
 0x29b   : > { %1217 = vpow2.f32 %v911_v44 }
 0x29e   : > { %v992_v47 = vpop.f32.mrb[4].mxu1 }
 0x29f   : > { %v993_v48 = vadd.f32 %v1115_v45, %v992_v47  ;;  %v1187_v49 = vpop.f32.mrb[5].mxu1 }
 0x2a1   : > { %997 = vst.msk [vmem:[%s492_s18] sm:$0xff] %vm996_vm4, %v993_v48 }
 0x2a5   : > { %v1218_v52 = vpop.eup %1217 }
 0x2a6   : > { %v913_v53 = vmul.f32 %v1218_v52, %v910_v51 }
 0x2a8   : > { %914 = vst.msk [vmem:[%s488_s21] sm:$0xff] %vm503_vm2, %v913_v53 }
 0x2a9 PF: > { %s27_s15 = sadd.s32 1, %s1225_s15  }
 0x2aa   : > { %p24_p4 = scmp.ge.s32.totalorder %s27_s15, 4  }
 0x2ac   :  { %26 = sbr.rel (!%p24_p4) target bundleno = 3 (0x3), region = 117 }

</bundles_post_ra>
